<compile_context>
chip_gen: v7x
topology: tpu7x:2x2x1
jax: 0.10.0
libtpu: 0.0.40
codegen_flags: <defaults>
</compile_context>

<pallas_src>
import functools

import jax
import jax.numpy as jnp
from jax.experimental import pallas as pl
from jax.experimental.pallas import tpu as pltpu


def _me_kernel(x_ref, pp_ref, ps_ref, rep_ref, wy_ref, wz_ref, bdz_ref,
               wex_ref, bex_ref, o_ref, *, n_segment):
    x2 = x_ref[0]                                                        # (C, W)

    # Mean over V for the current frame (y path) and for frame t+1 (z path),
    # via constant pooling matrices -> the x block stays lane-dense, no reshapes.
    pooled = jnp.dot(x2, pp_ref[...], preferred_element_type=jnp.float32)    # (C, T)
    pooled_n = jnp.dot(x2, ps_ref[...], preferred_element_type=jnp.float32)  # (C, T)

    # Folded linear path: W_y = squeeze*BN, W_z = squeeze*BN followed by conv1.
    y = jnp.dot(wy_ref[...], pooled, preferred_element_type=jnp.float32)       # (CR, T)
    z_next = jnp.dot(wz_ref[...], pooled_n, preferred_element_type=jnp.float32)  # (CR, T)

    # Motion difference; last frame of every n_segment block is zero-padded.
    diff = z_next - y + bdz_ref[...]                                      # (CR, T)
    t_idx = jax.lax.broadcasted_iota(jnp.int32, (1, diff.shape[1]), 1)
    keep = (t_idx % n_segment) != (n_segment - 1)
    diff = jnp.where(keep, diff, 0.0)

    # me_expand + sigmoid -> per-(channel, frame) gate.
    logits = jnp.dot(wex_ref[...], diff, preferred_element_type=jnp.float32)  # (C, T)
    gate = jax.nn.sigmoid(logits + bex_ref[...])                          # (C, T)

    # Replicate the per-frame gate across the V joints along lanes (MXU broadcast),
    # then apply it elementwise to the original input.
    gate_w = jnp.dot(gate, rep_ref[...], preferred_element_type=jnp.float32)  # (C, W)
    o_ref[0] = (x2 * gate_w).astype(o_ref.dtype)


def _choose_t_block(t, v, c, n_segment, budget_bytes=20 * 1024 * 1024):
    """Largest t-chunk that (a) divides t, (b) is a multiple of n_segment (so no
    cross-block temporal halo is needed), (c) keeps the flattened last dim a
    multiple of 128 lanes unless it is the full extent, and (d) fits a VMEM budget
    including the double-buffered x blocks and the constant pooling matrices."""
    fallback = t
    for t_blk in range(t, 0, -n_segment):
        if t % t_blk:
            continue
        if t_blk != t and (t_blk * v) % 128:
            continue
        fallback = t_blk
        x_bytes = 4 * c * t_blk * v * 4            # in + out, double buffered
        aux_bytes = 6 * t_blk * (t_blk * v) * 4    # pool / shift / replicate mats
        if x_bytes + aux_bytes <= budget_bytes:
            return t_blk
    return fallback


def motion_excitation(x, params, n_segment=3):
    """x: (n, c, t, v) float32, returns (n, c, t, v)."""
    n, c, t, v = x.shape
    assert c >= 16, "in_channels must be >= 16 (reduced_channels = c // 16)"
    assert t % n_segment == 0, "t must be divisible by n_segment"
    wsq, bsq, scale, shift, wc1, bc1, wex, bex = params
    cr = wsq.shape[1]

    # ---- trace-time weight folding: BN into squeeze, conv1 on top of it ----
    w_y = wsq * scale[None, :]                 # (c, cr)
    b_y = bsq * scale + shift                  # (cr,)
    w_z = w_y @ wc1                            # (c, cr)
    b_z = b_y @ wc1 + bc1                      # (cr,)

    t_blk = _choose_t_block(t, v, c, n_segment)
    w_blk = t_blk * v

    # Constant pooling / temporal-shift / lane-replication matrices (built once).
    eye_t = jnp.eye(t_blk, dtype=x.dtype)
    rep = jnp.repeat(eye_t, v, axis=1)                        # (t_blk, w_blk)
    p_pool = rep.T / v                                        # (w_blk, t_blk): mean over v
    p_shift = p_pool @ jnp.eye(t_blk, k=-1, dtype=x.dtype)    # column t -> mean of frame t+1

    # Native NCHW -> (n, c, t*v): free view, no HBM transpose.
    x_flat = x.reshape(n, c, t * v)

    args = (x_flat, p_pool, p_shift, rep,
            jnp.transpose(w_y), jnp.transpose(w_z),
            (b_z - b_y).reshape(cr, 1),
            jnp.transpose(wex), bex.reshape(c, 1))

    def _const_spec(arr):
        rank = arr.ndim
        return pl.BlockSpec(arr.shape, lambda i, j: (0,) * rank)

    in_specs = [pl.BlockSpec((1, c, w_blk), lambda i, j: (i, 0, j))]
    in_specs += [_const_spec(a) for a in args[1:]]

    grid = (n, t // t_blk)
    out_flat = pl.pallas_call(
        functools.partial(_me_kernel, n_segment=n_segment),
        out_shape=jax.ShapeDtypeStruct((n, c, t * v), x.dtype),
        grid=grid,
        in_specs=in_specs,
        out_specs=pl.BlockSpec((1, c, w_blk), lambda i, j: (i, 0, j)),
        compiler_params=pltpu.CompilerParams(
            dimension_semantics=("parallel", "parallel"),
            vmem_limit_bytes=32 * 1024 * 1024),
    )(*args)

    return out_flat.reshape(n, c, t, v)


def ref_forward(x, params, n_segment=3):
    """Pure-JAX mirror of the PyTorch forward (eval-mode BN), original op order."""
    wsq, bsq, scale, shift, wc1, bc1, wex, bex = params
    n, c, t, v = x.shape
    cr = wsq.shape[1]
    n_batch = (n * t) // n_segment

    y = jnp.einsum('nctv,cd->ndtv', x, wsq) + bsq.reshape(1, cr, 1, 1)
    y = y * scale.reshape(1, cr, 1, 1) + shift.reshape(1, cr, 1, 1)

    y_nt = jnp.transpose(y, (0, 2, 1, 3)).reshape(n * t, cr, v)
    x_plus0 = y_nt.reshape(n_batch, n_segment, cr, v)[:, : n_segment - 1]

    z = jnp.einsum('nctv,cd->ndtv', y, wc1) + bc1.reshape(1, cr, 1, 1)
    z_nt = jnp.transpose(z, (0, 2, 1, 3)).reshape(n * t, cr, v)
    x_plus1 = z_nt.reshape(n_batch, n_segment, cr, v)[:, 1:]

    x_me = x_plus1 - x_plus0
    x_me = jnp.pad(x_me, ((0, 0), (0, 1), (0, 0), (0, 0)))
    x_me = jnp.transpose(x_me.reshape(n, t, cr, v), (0, 2, 1, 3))
    x_me = jnp.mean(x_me, axis=3, keepdims=True)                  # (n, cr, t, 1)

    w = jnp.einsum('ndtv,dc->nctv', x_me, wex) + bex.reshape(1, c, 1, 1)
    return x * jax.nn.sigmoid(w)


def make_params(key, c):
    cr = c // 16
    ks = jax.random.split(key, 10)
    wsq = jax.random.normal(ks[0], (c, cr), jnp.float32) * 0.1
    bsq = jax.random.normal(ks[1], (cr,), jnp.float32) * 0.1
    gamma = 1.0 + 0.1 * jax.random.normal(ks[2], (cr,), jnp.float32)
    beta = 0.1 * jax.random.normal(ks[3], (cr,), jnp.float32)
    running_mean = 0.1 * jax.random.normal(ks[4], (cr,), jnp.float32)
    running_var = 1.0 + 0.1 * jnp.abs(jax.random.normal(ks[5], (cr,), jnp.float32))
    eps = 1e-5
    scale = gamma / jnp.sqrt(running_var + eps)
    shift = beta - running_mean * scale
    wc1 = jax.random.normal(ks[6], (cr, cr), jnp.float32) * 0.1
    bc1 = jax.random.normal(ks[7], (cr,), jnp.float32) * 0.1
    wex = jax.random.normal(ks[8], (cr, c), jnp.float32) * 0.1
    bex = jax.random.normal(ks[9], (c,), jnp.float32) * 0.1
    return (wsq, bsq, scale, shift, wc1, bc1, wex, bex)


if __name__ == "__main__":
    # Small shapes consistent with the module: in_channels >= 16 (cr = c // 16)
    # and t divisible by n_segment=3.
    n, c, t, v = 2, 64, 6, 16
    n_segment = 3

    key = jax.random.PRNGKey(0)
    k_x, k_p = jax.random.split(key)
    x = jax.random.normal(k_x, (n, c, t, v), jnp.float32)
    params = make_params(k_p, c)

    out = motion_excitation(x, params, n_segment=n_segment)
    out = jax.block_until_ready(out)

    ref = ref_forward(x, params, n_segment=n_segment)
    assert out.shape == (n, c, t, v)
    max_err = float(jnp.max(jnp.abs(out - ref)))
    assert jnp.allclose(out, ref, rtol=1e-4, atol=1e-4), max_err

    print("KERNEL_OK")
</pallas_src>

<mosaic_0001>
module attributes {stable_mosaic.version = 11 : i64} {
  func.func @_me_kernel(%arg0: i32, %arg1: i32, %arg2: memref<1x64x96xf32, #tpu.memory_space<vmem>>, %arg3: memref<96x6xf32, #tpu.memory_space<vmem>>, %arg4: memref<96x6xf32, #tpu.memory_space<vmem>>, %arg5: memref<6x96xf32, #tpu.memory_space<vmem>>, %arg6: memref<4x64xf32, #tpu.memory_space<vmem>>, %arg7: memref<4x64xf32, #tpu.memory_space<vmem>>, %arg8: memref<4x1xf32, #tpu.memory_space<vmem>>, %arg9: memref<64x4xf32, #tpu.memory_space<vmem>>, %arg10: memref<64x1xf32, #tpu.memory_space<vmem>>, %arg11: memref<1x64x96xf32, #tpu.memory_space<vmem>>) attributes {dimension_semantics = [#tpu.dimension_semantics<parallel>, #tpu.dimension_semantics<parallel>], iteration_bounds = array<i64: 2, 1>, scalar_prefetch = 0 : i64, scratch_operands = 0 : i64, tpu.core_type = #tpu.core_type<tc>, window_params = [{transform_indices = @transform_0, window_bounds = array<i64: 1, 64, 96>}, {pipeline_mode = #tpu.pipeline_mode<synchronous>, transform_indices = @transform_1, window_bounds = array<i64: 96, 6>}, {pipeline_mode = #tpu.pipeline_mode<synchronous>, transform_indices = @transform_2, window_bounds = array<i64: 96, 6>}, {pipeline_mode = #tpu.pipeline_mode<synchronous>, transform_indices = @transform_3, window_bounds = array<i64: 6, 96>}, {pipeline_mode = #tpu.pipeline_mode<synchronous>, transform_indices = @transform_4, window_bounds = array<i64: 4, 64>}, {pipeline_mode = #tpu.pipeline_mode<synchronous>, transform_indices = @transform_5, window_bounds = array<i64: 4, 64>}, {pipeline_mode = #tpu.pipeline_mode<synchronous>, transform_indices = @transform_6, window_bounds = array<i64: 4, 1>}, {pipeline_mode = #tpu.pipeline_mode<synchronous>, transform_indices = @transform_7, window_bounds = array<i64: 64, 4>}, {pipeline_mode = #tpu.pipeline_mode<synchronous>, transform_indices = @transform_8, window_bounds = array<i64: 64, 1>}, {transform_indices = @transform_9, window_bounds = array<i64: 1, 64, 96>}]} {
    %c0 = arith.constant 0 : index
    %c0_0 = arith.constant 0 : index
    %c0_1 = arith.constant 0 : index
    %0 = vector.load %arg2[%c0, %c0_0, %c0_1] : memref<1x64x96xf32, #tpu.memory_space<vmem>>, vector<1x64x96xf32>
    %1 = vector.shape_cast %0 : vector<1x64x96xf32> to vector<64x96xf32>
    %c0_2 = arith.constant 0 : index
    %c0_3 = arith.constant 0 : index
    %2 = vector.load %arg3[%c0_2, %c0_3] : memref<96x6xf32, #tpu.memory_space<vmem>>, vector<96x6xf32>
    %cst = arith.constant dense<0.000000e+00> : vector<64x6xf32>
    %3 = tpu.matmul %1, %2, %cst {dimension_numbers = #tpu.dot_dimension_numbers<[1], [0], [0], [1], [0, 0, 1, 1], [], []>} : vector<64x96xf32>, vector<96x6xf32>, vector<64x6xf32> -> vector<64x6xf32>
    %c0_4 = arith.constant 0 : index
    %c0_5 = arith.constant 0 : index
    %4 = vector.load %arg4[%c0_4, %c0_5] : memref<96x6xf32, #tpu.memory_space<vmem>>, vector<96x6xf32>
    %cst_6 = arith.constant dense<0.000000e+00> : vector<64x6xf32>
    %5 = tpu.matmul %1, %4, %cst_6 {dimension_numbers = #tpu.dot_dimension_numbers<[1], [0], [0], [1], [0, 0, 1, 1], [], []>} : vector<64x96xf32>, vector<96x6xf32>, vector<64x6xf32> -> vector<64x6xf32>
    %c0_7 = arith.constant 0 : index
    %c0_8 = arith.constant 0 : index
    %6 = vector.load %arg6[%c0_7, %c0_8] : memref<4x64xf32, #tpu.memory_space<vmem>>, vector<4x64xf32>
    %cst_9 = arith.constant dense<0.000000e+00> : vector<4x6xf32>
    %7 = tpu.matmul %6, %3, %cst_9 {dimension_numbers = #tpu.dot_dimension_numbers<[1], [0], [0], [1], [0, 0, 1, 1], [], []>} : vector<4x64xf32>, vector<64x6xf32>, vector<4x6xf32> -> vector<4x6xf32>
    %c0_10 = arith.constant 0 : index
    %c0_11 = arith.constant 0 : index
    %8 = vector.load %arg7[%c0_10, %c0_11] : memref<4x64xf32, #tpu.memory_space<vmem>>, vector<4x64xf32>
    %cst_12 = arith.constant dense<0.000000e+00> : vector<4x6xf32>
    %9 = tpu.matmul %8, %5, %cst_12 {dimension_numbers = #tpu.dot_dimension_numbers<[1], [0], [0], [1], [0, 0, 1, 1], [], []>} : vector<4x64xf32>, vector<64x6xf32>, vector<4x6xf32> -> vector<4x6xf32>
    %10 = arith.subf %9, %7 : vector<4x6xf32>
    %c0_13 = arith.constant 0 : index
    %c0_14 = arith.constant 0 : index
    %11 = vector.load %arg8[%c0_13, %c0_14] : memref<4x1xf32, #tpu.memory_space<vmem>>, vector<4x1xf32>
    %12 = vector.broadcast %11 : vector<4x1xf32> to vector<4x6xf32>
    %13 = arith.addf %10, %12 : vector<4x6xf32>
    %14 = tpu.iota {dimensions = array<i32: 1>} : vector<1x6xi32>
    %c3_i32 = arith.constant 3 : i32
    %c0_i32 = arith.constant 0 : i32
    %15 = arith.cmpi eq, %c3_i32, %c0_i32 : i32
    %c1_i32 = arith.constant 1 : i32
    %16 = arith.select %15, %c1_i32, %c3_i32 : i32
    %17 = vector.broadcast %16 : i32 to vector<1x6xi32>
    %18 = arith.remsi %14, %17 : vector<1x6xi32>
    %c0_i32_15 = arith.constant 0 : i32
    %19 = vector.broadcast %c0_i32_15 : i32 to vector<1x6xi32>
    %20 = arith.cmpi ne, %18, %19 : vector<1x6xi32>
    %c0_i32_16 = arith.constant 0 : i32
    %21 = vector.broadcast %c0_i32_16 : i32 to vector<1x6xi32>
    %22 = arith.cmpi slt, %18, %21 : vector<1x6xi32>
    %c0_i32_17 = arith.constant 0 : i32
    %23 = arith.cmpi slt, %16, %c0_i32_17 : i32
    %24 = vector.broadcast %23 : i1 to vector<1x6xi1>
    %25 = vector.broadcast %24 : vector<1x6xi1> to vector<1x6xi1>
    %26 = arith.xori %22, %25 : vector<1x6xi1>
    %27 = arith.andi %26, %20 : vector<1x6xi1>
    %28 = vector.broadcast %16 : i32 to vector<1x6xi32>
    %29 = arith.addi %18, %28 : vector<1x6xi32>
    %30 = arith.select %27, %29, %18 : vector<1x6xi1>, vector<1x6xi32>
    %c2_i32 = arith.constant 2 : i32
    %31 = vector.broadcast %c2_i32 : i32 to vector<1x6xi32>
    %32 = arith.cmpi ne, %30, %31 : vector<1x6xi32>
    %cst_18 = arith.constant 0.000000e+00 : f32
    %33 = vector.shape_cast %32 : vector<1x6xi1> to vector<1x6xi1>
    %34 = vector.broadcast %33 : vector<1x6xi1> to vector<4x6xi1>
    %35 = vector.broadcast %cst_18 : f32 to vector<4x6xf32>
    %36 = arith.select %34, %13, %35 : vector<4x6xi1>, vector<4x6xf32>
    %c0_19 = arith.constant 0 : index
    %c0_20 = arith.constant 0 : index
    %37 = vector.load %arg9[%c0_19, %c0_20] : memref<64x4xf32, #tpu.memory_space<vmem>>, vector<64x4xf32>
    %cst_21 = arith.constant dense<0.000000e+00> : vector<64x6xf32>
    %38 = tpu.matmul %37, %36, %cst_21 {dimension_numbers = #tpu.dot_dimension_numbers<[1], [0], [0], [1], [0, 0, 1, 1], [], []>} : vector<64x4xf32>, vector<4x6xf32>, vector<64x6xf32> -> vector<64x6xf32>
    %c0_22 = arith.constant 0 : index
    %c0_23 = arith.constant 0 : index
    %39 = vector.load %arg10[%c0_22, %c0_23] : memref<64x1xf32, #tpu.memory_space<vmem>>, vector<64x1xf32>
    %40 = vector.broadcast %39 : vector<64x1xf32> to vector<64x6xf32>
    %41 = arith.addf %38, %40 : vector<64x6xf32>
    %42 = arith.negf %41 : vector<64x6xf32>
    %43 = math.exp %42 : vector<64x6xf32>
    %cst_24 = arith.constant 1.000000e+00 : f32
    %44 = vector.broadcast %cst_24 : f32 to vector<64x6xf32>
    %45 = arith.addf %44, %43 : vector<64x6xf32>
    %46 = arith.divf %44, %45 : vector<64x6xf32>
    %c0_25 = arith.constant 0 : index
    %c0_26 = arith.constant 0 : index
    %47 = vector.load %arg5[%c0_25, %c0_26] : memref<6x96xf32, #tpu.memory_space<vmem>>, vector<6x96xf32>
    %cst_27 = arith.constant dense<0.000000e+00> : vector<64x96xf32>
    %48 = tpu.matmul %46, %47, %cst_27 {dimension_numbers = #tpu.dot_dimension_numbers<[1], [0], [0], [1], [0, 0, 1, 1], [], []>} : vector<64x6xf32>, vector<6x96xf32>, vector<64x96xf32> -> vector<64x96xf32>
    %49 = arith.mulf %1, %48 : vector<64x96xf32>
    %c0_28 = arith.constant 0 : index
    %c0_29 = arith.constant 0 : index
    %c0_30 = arith.constant 0 : index
    %50 = vector.load %arg11[%c0_28, %c0_29, %c0_30] : memref<1x64x96xf32, #tpu.memory_space<vmem>>, vector<1x64x96xf32>
    %51 = vector.shape_cast %50 : vector<1x64x96xf32> to vector<64x96xf32>
    %52 = vector.shape_cast %49 : vector<64x96xf32> to vector<1x64x96xf32>
    tpu.vector_store %arg11[%c0_28, %c0_29, %c0_30], %52 {strides = array<i32>} : memref<1x64x96xf32, #tpu.memory_space<vmem>>, vector<1x64x96xf32>,
    return
  }
  func.func @transform_0(%arg0: i32, %arg1: i32) -> (i32, i32, i32) {
    %c0_i32 = arith.constant 0 : i32
    %c0_i32_0 = arith.constant 0 : i32
    return %arg0, %c0_i32, %arg1 : i32, i32, i32
  }
  func.func @transform_1(%arg0: i32, %arg1: i32) -> (i32, i32) {
    %c0_i32 = arith.constant 0 : i32
    %c0_i32_0 = arith.constant 0 : i32
    %c0_i32_1 = arith.constant 0 : i32
    return %c0_i32, %c0_i32_0 : i32, i32
  }
  func.func @transform_2(%arg0: i32, %arg1: i32) -> (i32, i32) {
    %c0_i32 = arith.constant 0 : i32
    %c0_i32_0 = arith.constant 0 : i32
    %c0_i32_1 = arith.constant 0 : i32
    return %c0_i32, %c0_i32_0 : i32, i32
  }
  func.func @transform_3(%arg0: i32, %arg1: i32) -> (i32, i32) {
    %c0_i32 = arith.constant 0 : i32
    %c0_i32_0 = arith.constant 0 : i32
    %c0_i32_1 = arith.constant 0 : i32
    return %c0_i32, %c0_i32_0 : i32, i32
  }
  func.func @transform_4(%arg0: i32, %arg1: i32) -> (i32, i32) {
    %c0_i32 = arith.constant 0 : i32
    %c0_i32_0 = arith.constant 0 : i32
    %c0_i32_1 = arith.constant 0 : i32
    return %c0_i32, %c0_i32_0 : i32, i32
  }
  func.func @transform_5(%arg0: i32, %arg1: i32) -> (i32, i32) {
    %c0_i32 = arith.constant 0 : i32
    %c0_i32_0 = arith.constant 0 : i32
    %c0_i32_1 = arith.constant 0 : i32
    return %c0_i32, %c0_i32_0 : i32, i32
  }
  func.func @transform_6(%arg0: i32, %arg1: i32) -> (i32, i32) {
    %c0_i32 = arith.constant 0 : i32
    %c0_i32_0 = arith.constant 0 : i32
    %c0_i32_1 = arith.constant 0 : i32
    return %c0_i32, %c0_i32_0 : i32, i32
  }
  func.func @transform_7(%arg0: i32, %arg1: i32) -> (i32, i32) {
    %c0_i32 = arith.constant 0 : i32
    %c0_i32_0 = arith.constant 0 : i32
    %c0_i32_1 = arith.constant 0 : i32
    return %c0_i32, %c0_i32_0 : i32, i32
  }
  func.func @transform_8(%arg0: i32, %arg1: i32) -> (i32, i32) {
    %c0_i32 = arith.constant 0 : i32
    %c0_i32_0 = arith.constant 0 : i32
    %c0_i32_1 = arith.constant 0 : i32
    return %c0_i32, %c0_i32_0 : i32, i32
  }
  func.func @transform_9(%arg0: i32, %arg1: i32) -> (i32, i32, i32) {
    %c0_i32 = arith.constant 0 : i32
    %c0_i32_0 = arith.constant 0 : i32
    return %arg0, %c0_i32, %arg1 : i32, i32, i32
  }
}

</mosaic_0001>

<bundles_post_ra>
// kernel: tpu_custom_call.1
= control target key start
LH: loop header
LB: loop body
LE: loop exit
PB: predicated region body
PF: predicated region fallthrough
CT: control target
= control target key end

     0   :  { %14 = vsyncpa [#allocation3], 0  ;;  %s2208_s0 = inlined_call_operand.vmem [shape: f32[2,64,96], index: 0, kind: input, shape index: {}]   ;;  %s2209_s1 = inlined_call_operand.vmem [shape: f32[96,6], index: 1, kind: input, shape index: {}]   ;;  %s2210_s2 = inlined_call_operand.vmem [shape: f32[96,6], index: 2, kind: input, shape index: {}]   ;;  %s2211_s3 = inlined_call_operand.vmem [shape: f32[6,96], index: 3, kind: input, shape index: {}]   ;;  %s2212_s4 = inlined_call_operand.vmem [shape: f32[4,64], index: 4, kind: input, shape index: {}]   ;;  %s2213_s5 = inlined_call_operand.vmem [shape: f32[4,64], index: 5, kind: input, shape index: {}]   ;;  %s2214_s6 = inlined_call_operand.vmem [shape: f32[4,1], index: 6, kind: input, shape index: {}]   ;;  %s2215_s7 = inlined_call_operand.vmem [shape: f32[64,4], index: 7, kind: input, shape index: {}]   ;;  %s2216_s8 = inlined_call_operand.vmem [shape: f32[64,1], index: 8, kind: input, shape index: {}]   ;;  %s2217_s9 = inlined_call_operand.hbm [shape: f32[2,64,96], index: 9, kind: output, shape index: {}]  }
   0x1   :  { %16 = vsyncpa [#allocation3 + $0x1], 0  ;;  %s1863_s30 = smov 0   ;;  %s1865_s10 = smov 0  }
   0x2   :  { %s1867_s11 = smov 0   ;;  %s1869_s12 = smov 0  }
   0x3   :  { %s1871_s13 = smov 0   ;;  %s1873_s14 = smov 0  }
   0x4 LB: > { %s1284_s15 = sadd.s32 4294967295, %s1804_s14   ;;  %s1285_s16 = sadd.s32 4294967294, %s1804_s14   ;;  %s1804_s14 = sphi %s1873_s14, %s22_s14   ;;  %s1800_s13 = sphi %s1871_s13, %s2227_s13   ;;  %s1796_s12 = sphi %s1869_s12, %s2226_s12   ;;  %s1792_s11 = sphi %s1867_s11, %s2225_s11   ;;  %s1788_s10 = sphi %s1865_s10, %s2224_s10   ;;  %s1784_s30 = sphi %s1863_s30, %s2223_s30  }
   0x5   : > { %s34_s17 = sadd.s32 1, %s1800_s13  ;;  %s239_s18 = sadd.s32 1, %s1792_s11 }
   0x6   : > { %p36_p0 = scmp.ge.s32.totalorder %s34_s17, 2  ;;  %p249_p1 = scmp.ne.s32.totalorder %s1792_s11, %s1788_s10 }
   0x7   : > { %p250_p2 = scmp.eq.s32.totalorder %s1284_s15, 1  ;;  %p255_p3 = scmp.ne.s32.totalorder %s1788_s10, %s1784_s30 }
   0x8   : > { %s2229_s17 = smov (%p36_p0, %s34_s17), 0  ;;  %p256_p5 = scmp.eq.s32.totalorder %s1285_s16, 1 }
   0x9   : > { %2219 = sst [smem:[#allocation5_spill]] %s2229_s17  ;;  %p1903_p4 = por %p250_p2, %p249_p1 }
   0xa   : > { %s234_s20 = ssub.s32 %s1800_s13, %s2229_s17  ;;  %p1288_p6 = scmp.ge.s32.totalorder %s1804_s14, 1 }
   0xb   : > { %p237_p7 = scmp.eq.s32.totalorder %s234_s20, 0  ;;  %p1910_p8 = por %p256_p5, %p255_p3 }
   0xc   : > { %p309_p9 = scmp.lt.s32.totalorder %s1804_s14, 3 }
   0xd   : > { %s1916_s22 = scalar_select %p237_p7, %s1792_s11, %s239_s18  }
   0xe   : > { %p310_p10 = pnand %p1288_p6, %p309_p9 }
   0xf   : > { %v364_v0 = vld [vmem:[%s2209_s1] sm:$0xff] (!%p310_p10)  ;;  %v365_v1 = vld [vmem:[%s2209_s1 + $0x8] sm:$0xff] (!%p310_p10)  ;;  %p348_p11 = scmp.lt.s32.totalorder (!%p310_p10), %s1796_s12, 1  ;;  %v366_v5 = vld [vmem:[%s2209_s1 + $0x10] sm:$0xff] (!%p310_p10)  ;;  %vm376_vm0 = vcmask (!%p310_p10), 785408   ;;  %v1806_v44 = vmov (!%p310_p10), 0.0|0.0  }
  0x10   : > { %313 = sbr.rel (%p310_p10) target bundleno = 979 (0x3d3), region = 56  ;;  %v506_v2 = vld [vmem:[%s2210_s2] sm:$0xff] (!%p310_p10)  ;;  %v1557_v3 = vpack.c.bf16 (!%p310_p10), %v365_v1, %v364_v0  ;;  %v507_v4 = vld [vmem:[%s2210_s2 + $0x8] sm:$0xff] (!%p310_p10)  ;;  %v367_v6 = vld [vmem:[%s2209_s1 + $0x18] sm:$0xff] (!%p310_p10)  ;;  %vm1807_vm1 = vmmov (!%p310_p10), 0   ;;  %v1808_v45 = vmov (!%p310_p10), 0.0  }
  0x11   : > { %v1581_v7 = vpack.c.bf16 (!%p310_p10), %v507_v4, %v506_v2  ;;  %v1561_v8 = vpack.c.bf16 (!%p310_p10), %v367_v6, %v366_v5  ;;  %v508_v9 = vld [vmem:[%s2210_s2 + $0x10] sm:$0xff] (!%p310_p10)  ;;  %v509_v10 = vld [vmem:[%s2210_s2 + $0x18] sm:$0xff] (!%p310_p10)  ;;  %v368_v11 = vld [vmem:[%s2209_s1 + $0x20] sm:$0xff] (!%p310_p10)  ;;  %v1809_v47 = vmov (!%p310_p10), 0   ;;  %vm624_vm2 = vcmask (!%p310_p10), 523264   ;;  %s1810_s20 = smov (!%p310_p10), [#allocation2]  }
  0x12   : > { %1558 = vmatprep.subr.bf16.mxu0 (!%p310_p10), %v1557_v3  ;;  %v1585_v12 = vpack.c.bf16 (!%p310_p10), %v509_v10, %v508_v9  ;;  %v369_v13 = vld [vmem:[%s2209_s1 + $0x28] sm:$0xff] (!%p310_p10)  ;;  %v510_v14 = vld [vmem:[%s2210_s2 + $0x20] sm:$0xff] (!%p310_p10)  ;;  %v370_v18 = vld [vmem:[%s2209_s1 + $0x30] sm:$0xff] (!%p310_p10)  ;;  %1692 = vset.pattern.permute.xlu0 (!%p310_p10), %v1809_v47  ;;  %vm858_vm3 = vcmask (!%p310_p10), 31744   ;;  %vm883_vm8 = vcmask (!%p310_p10), 1043456   ;;  %vm1066_vm9 = vcmask (!%p310_p10), 1045504  }
  0x13   : > { %v511_v15 = vld [vmem:[%s2210_s2 + $0x28] sm:$0xff] (!%p310_p10)  ;;  %1582 = vmatprep.subr.bf16.mxu1 (!%p310_p10), %v1581_v7  ;;  %1560 = vmatpush3.bf16.msra.mxu0 (!%p310_p10), %v1557_v3  ;;  %v1565_v16 = vpack.c.bf16 (!%p310_p10), %v369_v13, %v368_v11  ;;  %v371_v19 = vld [vmem:[%s2209_s1 + $0x38] sm:$0xff] (!%p310_p10)  ;;  %v512_v20 = vld [vmem:[%s2210_s2 + $0x30] sm:$0xff] (!%p310_p10)  ;;  %vm1041_vm10 = vcmask (!%p310_p10), 48128  }
  0x14   : > { %1584 = vmatpush3.bf16.msra.mxu1 (!%p310_p10), %v1581_v7  ;;  %1562 = vmatprep.subr.bf16.mxu0 (!%p310_p10), %v1561_v8  ;;  %v1589_v17 = vpack.c.bf16 (!%p310_p10), %v511_v15, %v510_v14  ;;  %v513_v21 = vld [vmem:[%s2210_s2 + $0x38] sm:$0xff] (!%p310_p10)  ;;  %v1569_v23 = vpack.c.bf16 (!%p310_p10), %v371_v19, %v370_v18  ;;  %v372_v25 = vld [vmem:[%s2209_s1 + $0x40] sm:$0xff] (!%p310_p10)  ;;  %v373_v26 = vld [vmem:[%s2209_s1 + $0x48] sm:$0xff] (!%p310_p10)  ;;  %v780_v19 = vlaneseq (!%p310_p10) }
  0x15   : > { %1586 = vmatprep.subr.bf16.mxu1 (!%p310_p10), %v1585_v12  ;;  %v1593_v24 = vpack.c.bf16 (!%p310_p10), %v513_v21, %v512_v20  ;;  %v514_v27 = vld [vmem:[%s2210_s2 + $0x40] sm:$0xff] (!%p310_p10)  ;;  %v515_v28 = vld [vmem:[%s2210_s2 + $0x48] sm:$0xff] (!%p310_p10)  ;;  %v1573_v29 = vpack.c.bf16 (!%p310_p10), %v373_v26, %v372_v25  ;;  %v374_v31 = vld [vmem:[%s2209_s1 + $0x50] sm:$0xff] (!%p310_p10)  ;;  %1693 = vset.pattern.permute.xlu1 (!%p310_p10), %v1809_v47 }
  0x16   : > { %v1597_v30 = vpack.c.bf16 (!%p310_p10), %v515_v28, %v514_v27  ;;  %v375_v32 = vld [vmem:[%s2209_s1 + $0x58] sm:$0xff] (!%p310_p10)  ;;  %v516_v33 = vld [vmem:[%s2210_s2 + $0x50] sm:$0xff] (!%p310_p10)  ;;  %v773_v46 = vld [vmem:[%s2214_s6] sm:$0xf] (!%p310_p10)  ;;  %v781_v20 = vand.u32 (!%p310_p10), 127, %v780_v19 }
  0x17   : > { %s349_s15 = scalar_select %p348_p11, %s1796_s12, 1  ;;  %1564 = vmatpush3.bf16.msra.mxu0 %v1561_v8  ;;  %v517_v34 = vld [vmem:[%s2210_s2 + $0x58] sm:$0xff]  ;;  %v1577_v35 = vpack.c.bf16 %v375_v32, %v374_v31  ;;  %776 = vperm.xlu0 %1692, %v773_v46   ;;  %v810_v48 = vld [vmem:[%s2216_s8] sm:$0xff]  ;;  %v815_v50 = vld [vmem:[%s2216_s8 + $0x28] sm:$0xff] }
  0x18   : > { %1588 = vmatpush3.bf16.msra.mxu1 %v1585_v12  ;;  %1566 = vmatprep.subr.bf16.mxu0 %v1565_v16  ;;  %v1601_v36 = vpack.c.bf16 %v517_v34, %v516_v33  ;;  %v813_v49 = vld [vmem:[%s2216_s8 + $0x18] sm:$0xff]  ;;  %v623_v12 = vld [vmem:[%s2212_s4] sm:$0xf]  ;;  %v811_v15 = vld [vmem:[%s2216_s8 + $0x8] sm:$0xff] }
  0x19   : > { %s1341_s26 = sshll.u32 %s349_s15, 6  ;;  %1590 = vmatprep.subr.bf16.mxu1 %v1589_v17  ;;  %v817_v51 = vld [vmem:[%s2216_s8 + $0x38] sm:$0xff]  ;;  %v698_v13 = vld [vmem:[%s2213_s5] sm:$0xf]  ;;  %825 = vperm.xlu1 %1693, %v811_v15   ;;  %v816_v18 = vld [vmem:[%s2216_s8 + $0x30] sm:$0xff]  ;;  %s345_s15 = sand.u32 1, %s1788_s10  }
  0x1a   : > { %s1959_s29 = scalar_lea.vmem %s2208_s0, %s1341_s26  ;;  %v802_v14 = vld [vmem:[%s2215_s7] sm:$0xff]  ;;  %v805_v46 = vld [vmem:[%s2215_s7 + $0x18] sm:$0xff]  ;;  %s1289_s24 = sshll.u32 %s345_s15, 6 }
  0x1b   : > { %v1974_v22 = vld [vmem:[%s1959_s29] sm:$0xff]  ;;  %1568 = vmatpush3.bf16.msra.mxu0 %v1565_v16  ;;  %v2005_v37 = vld [vmem:[%s1959_s29 + $0x8] sm:$0xff]  ;;  %v2008_v38 = vld [vmem:[%s1959_s29 + $0x10] sm:$0xff]  ;;  %820 = vperm.xlu0 %1692, %v810_v48   ;;  %s347_s25 = scalar_lea.vmem [#allocation2], %s1289_s24  ;;  %s1342_s26 = sshll.u32 %s1796_s12, 10 }
  0x1c   : > { %1443 = vmatprep.mubr.msk.f32.mxu0 %vm376_vm0, %v1974_v22  ;;  %1479 = vmatprep.mubr.msk.f32.mxu1 %vm376_vm0, %v1974_v22  ;;  %v2017_v39 = vld [vmem:[%s1959_s29 + $0x18] sm:$0xff]  ;;  %v2022_v40 = vld [vmem:[%s1959_s29 + $0x20] sm:$0xff]  ;;  %v2031_v41 = vld [vmem:[%s1959_s29 + $0x28] sm:$0xff]  ;;  %s1206_s27 = sshll.u32 %s347_s25, 4  ;;  %s2153_s17 = scalar_lea.hbm %s2217_s9, %s1342_s26  ;;  %s2155_s27 = int_to_ptr.vmem [resolvable:$true] %s1206_s27 }
  0x1d   : > { %1592 = vmatpush3.bf16.msra.mxu1 %v1589_v17  ;;  %1570 = vmatprep.subr.bf16.mxu0 %v1569_v23  ;;  %v2036_v42 = vld [vmem:[%s1959_s29 + $0x30] sm:$0xff]  ;;  %v2045_v43 = vld [vmem:[%s1959_s29 + $0x38] sm:$0xff]  ;;  %v814_v17 = vld [vmem:[%s2216_s8 + $0x20] sm:$0xff]  ;;  %s2162_s12 = scalar_lea.sflag [#allocation3], %s345_s15  ;;  %s1726_s18 = scalar_lea.vmem %s2155_s27, 1024 }
  0x1e   : > { %1594 = vmatprep.subr.bf16.mxu1 %v1593_v24  ;;  %v812_v16 = vld [vmem:[%s2216_s8 + $0x10] sm:$0xff]  ;;  %v806_v47 = vld [vmem:[%s2215_s7 + $0x20] sm:$0xff]  ;;  %v807_v48 = vld [vmem:[%s2215_s7 + $0x28] sm:$0xff]  ;;  %p1727_p12 = scmp.ne.s32.totalorder %s2155_s27, %s1726_s18  ;;  %s1730_s29 = sshll.u32 %s1810_s20, 4  ;;  %s1731_s29 = int_to_ptr.vmem [resolvable:$false] %s1730_s29 }
  0x1f   : > { %1572 = vmatpush3.bf16.msra.mxu0 %v1569_v23  ;;  %835 = vperm.xlu0 %1692, %v813_v49   ;;  %v2090_v21 = vmul.u32.u64.low 2863311531, %v781_v20  ;;  %v2091_v23 = vmul.u32.u64.high 2863311531, %v781_v20, %v2090_v21  ;;  %v808_v49 = vld [vmem:[%s2215_s7 + $0x30] sm:$0xff]  ;;  %s1732_s23 = scalar_lea.vmem %s1731_s29, 2048  ;;  %p1733_p1 = scmp.lt.s32.totalorder %s2155_s27, %s1731_s29 }
  0x20   : > { %1574 = vmatprep.subr.bf16.mxu0 %v1573_v29  ;;  %830 = vperm.xlu1 %1693, %v812_v16   ;;  %p1728_p13 = pnand %p1727_p12, %p1903_p4  ;;  %p1734_p2 = scmp.lt.s32.totalorder %s1732_s23, %s1726_s18 }
  0x21   : > { %1596 = vmatpush3.bf16.msra.mxu1 %v1593_v24  ;;  %v788_v24 = vshrl.u32 %v2091_v23, 1 }
  0x22   : > { %1598 = vmatprep.subr.bf16.mxu1 %v1597_v30  ;;  %p1729_p0 = pneg %p1728_p13  ;;  %p1735_p3 = por %p1734_p2, %p1733_p1 }
  0x23   : > { %1576 = vmatpush3.bf16.msra.mxu0 %v1573_v29  ;;  %845 = vperm.xlu0 %1692, %v815_v50   ;;  %v789_v25 = vmul.u32 3, %v788_v24  ;;  %v809_v50 = vld [vmem:[%s2215_s7 + $0x38] sm:$0xff] }
  0x24   : > { %1578 = vmatprep.subr.bf16.mxu0 %v1577_v35  ;;  %840 = vperm.xlu1 %1693, %v814_v17   ;;  %p1736_p5 = pnand %p1735_p3, %p1729_p0 }
  0x25   : > { %1600 = vmatpush3.bf16.msra.mxu1 %v1597_v30  ;;  %v790_v26 = vsub.s32 %v781_v20, %v789_v25 }
  0x26   : > { %1602 = vmatprep.subr.bf16.mxu1 %v1601_v36 }
  0x27   : > { %1580 = vmatpush3.bf16.msra.mxu0 %v1577_v35  ;;  %855 = vperm.xlu0 %1692, %v817_v51   ;;  %vm793_vm4 = vcmp.ne.s32.totalorder %v790_v26, 0  ;;  %vm794_vm5 = vcmp.lt.s32.totalorder %v790_v26, 0  ;;  %v796_v27 = vadd.s32 3, %v790_v26  ;;  %v1040_v51 = vld [vmem:[%s2211_s3] sm:$0x3f] }
  0x28   : > { %1605 = vmatprep.subr.bf16.mxu0 %v1806_v44  ;;  %850 = vperm.xlu1 %1693, %v816_v18   ;;  %vm795_vm6 = vmand %vm794_vm5, %vm793_vm4 }
  0x29   : > { %1604 = vmatpush3.bf16.msra.mxu1 %v1601_v36  ;;  %v797_v29 = vsel %vm795_vm6, %v796_v27, %v790_v26 }
  0x2a   : > { %1444 = vmatmul.mubr.msk.f32.vlgmr.msra.gmra.mrb[0].mxu0 %vm376_vm0, %v2005_v37  ;;  %1617 = vmatprep.subr.bf16.mxu1 %v1806_v44  ;;  %vm798_vm7 = vcmp.ne.s32.totalorder %v797_v29, 2 }
  0x2b   : > { %1446 = vmatprep.mubr.msk.f32.mxu0 %vm376_vm0, %v2008_v38 }
  0x2c   : > { %1480 = vmatmul.mubr.msk.f32.vlgmr.msra.gmra.mrb[0].mxu1 %vm376_vm0, %v2005_v37 }
  0x2d   : > { %1482 = vmatprep.mubr.msk.f32.mxu1 %vm376_vm0, %v2008_v38 }
  0x2e   : > { %1447 = vmatmul.mubr.msk.f32.gmra.mrb[2].mxu0 %vm376_vm0, %v2017_v39 }
  0x2f   : > { %1449 = vmatprep.mubr.msk.f32.mxu0 %vm376_vm0, %v2022_v40 }
  0x30   : > { %1483 = vmatmul.mubr.msk.f32.gmra.mrb[2].mxu1 %vm376_vm0, %v2017_v39 }
  0x31   : > { %1485 = vmatprep.mubr.msk.f32.mxu1 %vm376_vm0, %v2022_v40 }
  0x32   : > { %1450 = vmatmul.mubr.msk.f32.gmra.mrb[4].mxu0 %vm376_vm0, %v2031_v41 }
  0x33   : > { %1452 = vmatprep.mubr.msk.f32.mxu0 %vm376_vm0, %v2036_v42 }
  0x34   : > { %1486 = vmatmul.mubr.msk.f32.gmra.mrb[4].mxu1 %vm376_vm0, %v2031_v41 }
  0x35   : > { %1488 = vmatprep.mubr.msk.f32.mxu1 %vm376_vm0, %v2036_v42 }
  0x36   : > { %1453 = vmatmul.mubr.msk.f32.gmra.mrb[6].mxu0 %vm376_vm0, %v2045_v43 }
  0x37   : > { %1507 = vmatprep.mubr.msk.f32.mxu0 %vm1807_vm1, %v1808_v45 }
  0x38   : > { %1489 = vmatmul.mubr.msk.f32.gmra.mrb[6].mxu1 %vm376_vm0, %v2045_v43 }
  0x39   : > { %1526 = vmatprep.mubr.msk.f32.mxu1 %vm1807_vm1, %v1808_v45  ;;  %v804_v45 = vld [vmem:[%s2215_s7 + $0x10] sm:$0xff] }
  0x96   : > { %v777_v34 = vpop.permute.xlu0 %776 }
  0xfd   : > { %v1445_v52 = vpop.f32.mrb[0].mxu0 }
  0xfe   : > { %v467_v54 = vpop.f32.mrb[1].mxu0 }
  0xff   : > { %v1481_v53 = vpop.f32.mrb[0].mxu1  ;;  %v1606_v55 = vpack.c.bf16 %v1445_v52, %v467_v54  ;;  %v821_v52 = vpop.permute.xlu0 %820 }
 0x100   : > { %v584_v56 = vpop.f32.mrb[1].mxu1 }
 0x101   : > { %v1618_v57 = vpack.c.bf16 %v1481_v53, %v584_v56  ;;  %v1448_v58 = vpop.f32.mrb[2].mxu0  ;;  %1607 = vmatpush3.bf16.msra.mxu0 %v1606_v55  ;;  %v826_v53 = vpop.permute.xlu1 %825 }
 0x102   : > { %v477_v60 = vpop.f32.mrb[3].mxu0  ;;  %1608 = vmatprep.subr.bf16.mxu0 %v1806_v44 }
 0x103   : > { %v1484_v59 = vpop.f32.mrb[2].mxu1  ;;  %1619 = vmatpush3.bf16.msra.mxu1 %v1618_v57  ;;  %v1609_v61 = vpack.c.bf16 %v1448_v58, %v477_v60  ;;  %v836_v54 = vpop.permute.xlu0 %835 }
 0x104   : > { %v594_v62 = vpop.f32.mrb[3].mxu1  ;;  %1620 = vmatprep.subr.bf16.mxu1 %v1806_v44 }
 0x105   : > { %v1621_v63 = vpack.c.bf16 %v1484_v59, %v594_v62  ;;  %v1451_v0 = vpop.f32.mrb[4].mxu0  ;;  %1610 = vmatpush3.bf16.msra.mxu0 %v1609_v61  ;;  %v831_v56 = vpop.permute.xlu1 %830 }
 0x106   : > { %v487_v2 = vpop.f32.mrb[5].mxu0  ;;  %1611 = vmatprep.subr.bf16.mxu0 %v1806_v44 }
 0x107   : > { %v1487_v1 = vpop.f32.mrb[4].mxu1  ;;  %1622 = vmatpush3.bf16.msra.mxu1 %v1621_v63  ;;  %v1612_v3 = vpack.c.bf16 %v1451_v0, %v487_v2 }
 0x108   : > { %v604_v4 = vpop.f32.mrb[5].mxu1  ;;  %1623 = vmatprep.subr.bf16.mxu1 %v1806_v44 }
 0x109   : > { %v1624_v5 = vpack.c.bf16 %v1487_v1, %v604_v4  ;;  %v1454_v6 = vpop.f32.mrb[6].mxu0  ;;  %1613 = vmatpush3.bf16.msra.mxu0 %v1612_v3  ;;  %v846_v1 = vpop.permute.xlu0 %845 }
 0x10a   : > { %v497_v8 = vpop.f32.mrb[7].mxu0  ;;  %1614 = vmatprep.subr.bf16.mxu0 %v1806_v44  ;;  %v841_v3 = vpop.permute.xlu1 %840 }
 0x10b   : > { %v1490_v7 = vpop.f32.mrb[6].mxu1  ;;  %1625 = vmatpush3.bf16.msra.mxu1 %v1624_v5  ;;  %v1615_v9 = vpack.c.bf16 %v1454_v6, %v497_v8 }
 0x10c   : > { %v614_v10 = vpop.f32.mrb[7].mxu1  ;;  %1626 = vmatprep.subr.bf16.mxu1 %v1806_v44  ;;  %v803_v44 = vld [vmem:[%s2215_s7 + $0x8] sm:$0xff] }
 0x10d   : > { %v1627_v11 = vpack.c.bf16 %v1490_v7, %v614_v10  ;;  %1616 = vmatpush3.bf16.msra.mxu0 %v1615_v9 }
 0x10f   : > { %1628 = vmatpush3.bf16.msra.mxu1 %v1627_v11  ;;  %v856_v11 = vpop.permute.xlu0 %855 }
 0x110   : > { %1508 = vmatmul.mubr.msk.f32.vlgmr.msra.gmra.mrb[8].mxu0 %vm624_vm2, %v623_v12  ;;  %1543 = vmatprep.subr.msk.mxu1 %vm1066_vm9, %v1040_v51 }
 0x111   : > { %1531 = vmatprep.mubr.msk.f32.mxu0 %vm858_vm3, %v802_v14  ;;  %v851_v14 = vpop.permute.xlu1 %850 }
 0x112   : > { %1527 = vmatmul.mubr.msk.f32.vlgmr.msra.gmra.mrb[8].mxu1 %vm624_vm2, %v698_v13 }
 0x113   : > { %1544 = vmatpush3.msk.msra.mxu1 %vm1066_vm9, %v1040_v51 }
 0x1e3   : > { %v694_v28 = vpop.f32.mrb[8].mxu0 }
 0x1e4   : > { %v1509_v31 = vpop.f32.mrb[9].mxu0 }
 0x1e5   : > { %v768_v30 = vpop.f32.mrb[8].mxu1 }
 0x1e6   : > { %v772_v32 = vsub.f32 %v768_v30, %v694_v28  ;;  %v1528_v33 = vpop.f32.mrb[9].mxu1 }
 0x1e8   : > { %v779_v35 = vadd.f32 %v777_v34, %v772_v32 }
 0x1ea   : > { %v801_v36 = vsel %vm798_vm7, %v779_v35, 0.0 }
 0x1eb   : > { %1529 = vmatprep.subr.msk.mxu0 %vm883_vm8, %v801_v36 }
 0x1ec   : > { %1530 = vmatpush3.msk.msra.mxu0 %vm883_vm8, %v801_v36 }
 0x1ed   : > { %1532 = vmatmul.mubr.msk.f32.vlgmr.msra.gmra.mrb[10].mxu0 %vm858_vm3, %v803_v44 }
 0x1ee   : > { %1534 = vmatprep.mubr.msk.f32.mxu0 %vm858_vm3, %v804_v45 }
 0x1f1   : > { %1535 = vmatmul.mubr.msk.f32.gmra.mrb[12].mxu0 %vm858_vm3, %v805_v46 }
 0x1f2   : > { %1537 = vmatprep.mubr.msk.f32.mxu0 %vm858_vm3, %v806_v47 }
 0x1f5   : > { %1538 = vmatmul.mubr.msk.f32.gmra.mrb[14].mxu0 %vm858_vm3, %v807_v48 }
 0x1f6   : > { %1540 = vmatprep.mubr.msk.f32.mxu0 %vm858_vm3, %v808_v49 }
 0x1f9   : > { %1541 = vmatmul.mubr.msk.f32.gmra.mrb[16].mxu0 %vm858_vm3, %v809_v50 }
 0x2c0   : > { %v1533_v55 = vpop.f32.mrb[10].mxu0 }
 0x2c1   : > { %v959_v57 = vadd.f32 %v1533_v55, %v826_v53  ;;  %v953_v58 = vpop.f32.mrb[11].mxu0 }
 0x2c2   : > { %v954_v59 = vadd.f32 %v953_v58, %v821_v52 }
 0x2c3   : > { %v1320_v60 = vmul.f32 -1.442695, %v959_v57 }
 0x2c4   : > { %v1319_v61 = vmul.f32 -1.442695, %v954_v59  ;;  %v1536_v62 = vpop.f32.mrb[12].mxu0 }
 0x2c5   : > { %1694 = vpow2.f32 %v1320_v60  ;;  %v969_v63 = vadd.f32 %v1536_v62, %v836_v54  ;;  %v963_v0 = vpop.f32.mrb[13].mxu0 }
 0x2c6   : > { %1696 = vpow2.f32 %v1319_v61  ;;  %v964_v2 = vadd.f32 %v963_v0, %v831_v56 }
 0x2c7   : > { %v1322_v4 = vmul.f32 -1.442695, %v969_v63 }
 0x2c8   : > { %v1321_v5 = vmul.f32 -1.442695, %v964_v2  ;;  %v1539_v6 = vpop.f32.mrb[14].mxu0 }
 0x2c9   : > { %1698 = vpow2.f32 %v1322_v4  ;;  %v979_v7 = vadd.f32 %v1539_v6, %v846_v1  ;;  %v973_v8 = vpop.f32.mrb[15].mxu0 }
 0x2ca   : > { %1700 = vpow2.f32 %v1321_v5  ;;  %v974_v9 = vadd.f32 %v973_v8, %v841_v3 }
 0x2cb   : > { %v1324_v10 = vmul.f32 -1.442695, %v979_v7 }
 0x2cc   : > { %v1323_v12 = vmul.f32 -1.442695, %v974_v9  ;;  %v1542_v13 = vpop.f32.mrb[16].mxu0 }
 0x2cd   : > { %1702 = vpow2.f32 %v1324_v10  ;;  %v989_v15 = vadd.f32 %v1542_v13, %v856_v11  ;;  %v983_v16 = vpop.f32.mrb[17].mxu0 }
 0x2ce   : > { %1704 = vpow2.f32 %v1323_v12  ;;  %v984_v17 = vadd.f32 %v983_v16, %v851_v14 }
 0x2cf   : > { %v1695_v18 = vpop.eup %1694  ;;  %v1326_v19 = vmul.f32 -1.442695, %v989_v15 }
 0x2d0   : > { %v1697_v20 = vpop.eup %1696  ;;  %v1017_v21 = vadd.f32 1.0, %v1695_v18  ;;  %v1325_v23 = vmul.f32 -1.442695, %v984_v17 }
 0x2d1   : > { %v1016_v24 = vadd.f32 1.0, %v1697_v20  ;;  %1706 = vpow2.f32 %v1326_v19 }
 0x2d2   : > { %1708 = vrcp.f32 %v1017_v21 }
 0x2d3   : > { %v1699_v25 = vpop.eup %1698  ;;  %1710 = vrcp.f32 %v1016_v24 }
 0x2d4   : > { %v1701_v26 = vpop.eup %1700  ;;  %v1019_v27 = vadd.f32 1.0, %v1699_v25  ;;  %1712 = vpow2.f32 %v1325_v23 }
 0x2d5   : > { %v1018_v28 = vadd.f32 1.0, %v1701_v26 }
 0x2d7   : > { %v1703_v29 = vpop.eup %1702  ;;  %1714 = vrcp.f32 %v1018_v28 }
 0x2d8   : > { %v1705_v30 = vpop.eup %1704  ;;  %1716 = vrcp.f32 %v1019_v27  ;;  %v1021_v31 = vadd.f32 1.0, %v1703_v29 }
 0x2d9   : > { %v1020_v32 = vadd.f32 1.0, %v1705_v30 }
 0x2db   : > { %v1707_v33 = vpop.eup %1706  ;;  %1718 = vrcp.f32 %v1020_v32 }
 0x2dc   : > { %v1709_v34 = vpop.eup %1708  ;;  %1720 = vrcp.f32 %v1021_v31  ;;  %v1023_v44 = vadd.f32 1.0, %v1707_v33 }
 0x2dd   : > { %v1711_v35 = vpop.eup %1710 }
 0x2de   : > { %v1713_v36 = vpop.eup %1712  ;;  %1545 = vmatprep.mubr.msk.f32.mxu1 %vm1041_vm10, %v1711_v35 }
 0x2df   : > { %v1022_v45 = vadd.f32 1.0, %v1713_v36  ;;  %1546 = vmatmul.mubr.msk.f32.vlgmr.msra.gmra.mrb[10].mxu1 %vm1041_vm10, %v1709_v34 }
 0x2e1   : > { %v1715_v46 = vpop.eup %1714  ;;  %1722 = vrcp.f32 %v1022_v45 }
 0x2e2   : > { %v1717_v47 = vpop.eup %1716  ;;  %1724 = vrcp.f32 %v1023_v44  ;;  %1548 = vmatprep.mubr.msk.f32.mxu1 %vm1041_vm10, %v1715_v46 }
 0x2e3   : > { %1549 = vmatmul.mubr.msk.f32.gmra.mrb[12].mxu1 %vm1041_vm10, %v1717_v47 }
 0x2e5   : > { %v1719_v48 = vpop.eup %1718 }
 0x2e6   : > { %v1721_v49 = vpop.eup %1720  ;;  %1551 = vmatprep.mubr.msk.f32.mxu1 %vm1041_vm10, %v1719_v48 }
 0x2e7   : > { %1552 = vmatmul.mubr.msk.f32.gmra.mrb[14].mxu1 %vm1041_vm10, %v1721_v49 }
 0x2eb   : > { %v1723_v50 = vpop.eup %1722 }
 0x2ec   : > { %v1725_v51 = vpop.eup %1724  ;;  %1554 = vmatprep.mubr.msk.f32.mxu1 %vm1041_vm10, %v1723_v50 }
 0x2ed   : > { %1555 = vmatmul.mubr.msk.f32.gmra.mrb[16].mxu1 %vm1041_vm10, %v1725_v51 }
 0x3b2   : > { %v1547_v52 = vpop.f32.mrb[10].mxu1 }
 0x3b3   : > { %v1176_v53 = vmul.f32 %v1547_v52, %v2005_v37  ;;  %v1136_v54 = vpop.f32.mrb[11].mxu1 }
 0x3b4   : > { %v1175_v55 = vmul.f32 %v1136_v54, %v1974_v22 }
 0x3b5   : > { %1184 = vst.msk [vmem:[%s347_s25 + $0x8] sm:$0xff] %vm376_vm0, %v1176_v53 }
 0x3b6   : > { %1183 = vst.msk [vmem:[%s347_s25] sm:$0xff] %vm376_vm0, %v1175_v55  ;;  %v1550_v56 = vpop.f32.mrb[12].mxu1 }
 0x3b7   : > { %v1178_v57 = vmul.f32 %v1550_v56, %v2017_v39  ;;  %v1146_v58 = vpop.f32.mrb[13].mxu1 }
 0x3b8   : > { %v1177_v59 = vmul.f32 %v1146_v58, %v2008_v38 }
 0x3b9   : > { %1186 = vst.msk [vmem:[%s347_s25 + $0x18] sm:$0xff] %vm376_vm0, %v1178_v57 }
 0x3ba   : > { %1185 = vst.msk [vmem:[%s347_s25 + $0x10] sm:$0xff] %vm376_vm0, %v1177_v59  ;;  %v1553_v37 = vpop.f32.mrb[14].mxu1 }
 0x3bb   : > { %v1180_v22 = vmul.f32 %v1553_v37, %v2031_v41  ;;  %v1156_v60 = vpop.f32.mrb[15].mxu1 }
 0x3bc   : > { %v1179_v61 = vmul.f32 %v1156_v60, %v2022_v40 }
 0x3bd   : > { %1188 = vst.msk [vmem:[%s347_s25 + $0x28] sm:$0xff] %vm376_vm0, %v1180_v22 }
 0x3be   : > { %1187 = vst.msk [vmem:[%s347_s25 + $0x20] sm:$0xff] %vm376_vm0, %v1179_v61 }
 0x3c0   : > { %v1556_v39 = vpop.f32.mrb[16].mxu1 }
 0x3c1   : > { %v1182_v38 = vmul.f32 %v1556_v39, %v2045_v43  ;;  %v1166_v62 = vpop.f32.mrb[17].mxu1 }
 0x3c2   : > { %v1181_v40 = vmul.f32 %v1166_v62, %v2036_v42 }
 0x3c3   : > { %1190 = vst.msk [vmem:[%s347_s25 + $0x38] sm:$0xff] %vm376_vm0, %v1182_v38 }
 0x3c4   : > { %1189 = vst.msk [vmem:[%s347_s25 + $0x30] sm:$0xff] %vm376_vm0, %v1181_v40 }
 0x3c5   : > { %1739 = shalt.err (!%p1736_p5)
}
 0x3c6   : > { %s1740_s15 = scalar_lea.hbm %s2153_s17, 1024  ;;  %s1744_s26 = scalar_lea.hbm %s2217_s9, 2048 }
 0x3c7   : > { %p1741_p6 = scmp.ne.s32.totalorder %s2153_s17, %s1740_s15  ;;  %p1745_p10 = scmp.lt.u32.totalorder %s2153_s17, %s2217_s9 }
 0x3c8   : > { %p1746_p11 = scmp.lt.u32.totalorder %s1744_s26, %s1740_s15  ;;  %p1748_p13 = scmp.lt.u32.totalorder %s1740_s15, %s2153_s17 }
 0x3c9   : > { %p1742_p7 = pnand %p1741_p6, %p1903_p4 }
 0x3ca   : > { %p1747_p12 = por %p1746_p11, %p1745_p10 }
 0x3cb   : > { %p1743_p9 = pneg %p1742_p7 }
 0x3cc   : > { %p1749_p0 = por %p1748_p13, %p1747_p12 }
 0x3ce   : > { %p1750_p1 = pnand %p1749_p0, %p1743_p9 }
 0x3d0   : > { %1753 = shalt.err (!%p1750_p1)
}
 0x3d1   : > { %s1811_s18 = smov 128   ;;  %s1812_s20 = smov 8  }
 0x3d2   : > { %1631 = dma.vmem_to_hbm [thread:$0]  (%p1903_p4), %s2155_s27, 1024, %s2153_s17, %s2162_s12, %s1811_s18, %s1811_s18, %s1812_s20  }
 0x3d3 PF: > { %p1637_p2 = scmp.ge.s32.totalorder %s1804_s14, 2  ;;  %s1221_s29 = sand.u32 1, %s1784_s30  }
 0x3d4   : > { %s1222_s23 = scalar_lea.sflag [#allocation3], %s1221_s29 }
 0x3d5   : > { %p1634_p3 = pnand %p1637_p2, %p1910_p8 }
 0x3d7   : > { %1779 = dma.done.wait (!%p1634_p3), %s1222_s23, 1024  }
 0x3d8   : > { %1781 = vsyncadd (!%p1634_p3), %s1222_s23, 4294966272  ;;  %s22_s14 = sadd.s32 1, %s1804_s14   ;;  %s2222_s19 = sld [smem:[#allocation5_spill]] }
 0x3d9   : > { %p19_p5 = scmp.ge.s32.totalorder %s22_s14, 4   ;;  %s2223_s30 = smov %s1788_s10 }
 0x3da   : > { %s2224_s10 = smov %s1792_s11  ;;  %s2225_s11 = smov %s1916_s22 }
 0x3db   : > { %s2226_s12 = smov %s1800_s13  ;;  %21 = sbr.rel (!%p19_p5) target bundleno = 4 (0x4), region = 91 }
 0x3de   : > { %s2227_s13 = smov %s2222_s19 }
 0x3e2   :  { %1227 = vsyncpa [#allocation3], 1 }
 0x3e3   :  { %1229 = vsyncpa [#allocation3 + $0x1], 1 }

</bundles_post_ra>
